<compile_context>
chip_gen: v5e
topology: v5e:2x2
jax: 0.10.0
libtpu: 0.0.40
codegen_flags: <defaults>
</compile_context>

<pallas_src>
import numpy as np

import jax
import jax.numpy as jnp
from jax.experimental import pallas as pl
from jax.experimental.pallas import tpu as pltpu


H, W = 34, 4  # spatial map implied by fc1 (34 * 4 * 4 = 544)


def _round_up(v, m):
    return -(-v // m) * m


# ------------------------------ Pallas kernel -------------------------------
def _fused_cnn_kernel(x_ref, m1_ref, b1_ref, m2_ref, b2_ref, m3_ref, b3_ref,
                      o_ref):
    """out = relu(relu(x@M1+b1) @ M2 + b2) @ M3 + b3, all resident in VMEM."""
    h1 = jnp.dot(x_ref[...], m1_ref[...], preferred_element_type=jnp.float32)
    h1 = jnp.maximum(h1 + b1_ref[...], 0.0)                  # conv1 + ReLU
    h2 = jnp.dot(h1, m2_ref[...], preferred_element_type=jnp.float32)
    h2 = jnp.maximum(h2 + b2_ref[...], 0.0)                  # conv2 + ReLU
    out = jnp.dot(h2, m3_ref[...], preferred_element_type=jnp.float32)
    o_ref[...] = (out + b3_ref[...]).astype(o_ref.dtype)     # fc1 (no act)


def fused_forward(prepared, x_flat):
    m1, b1, m2, b2, m3, b3 = prepared
    B = x_flat.shape[0]
    n_out = m3.shape[1]                                      # 128 (lane-dense)
    return pl.pallas_call(
        _fused_cnn_kernel,
        out_shape=jax.ShapeDtypeStruct((B, n_out), jnp.float32),
        grid=(1,),
        in_specs=[
            pl.BlockSpec(x_flat.shape, lambda i: (0, 0)),
            pl.BlockSpec(m1.shape, lambda i: (0, 0)),
            pl.BlockSpec(b1.shape, lambda i: (0, 0)),
            pl.BlockSpec(m2.shape, lambda i: (0, 0)),
            pl.BlockSpec(b2.shape, lambda i: (0, 0)),
            pl.BlockSpec(m3.shape, lambda i: (0, 0)),
            pl.BlockSpec(b3.shape, lambda i: (0, 0)),
        ],
        out_specs=pl.BlockSpec((B, n_out), lambda i: (0, 0)),
        compiler_params=pltpu.CompilerParams(
            dimension_semantics=("arbitrary",)),
    )(x_flat, m1, b1, m2, b2, m3, b3)


def cnn_forward(prepared, x, num_action=34):
    B = x.shape[0]
    # NCHW row-major flatten == torch view(-1, C*H*W); single cheap HLO.
    x_flat = x.astype(jnp.float32).reshape(B, -1)
    out = fused_forward(prepared, x_flat)                    # (B, 128)
    return out[:, :num_action]                               # lane-dense slab -> logits


# --------------------- one-off parameter preparation ------------------------
def _conv3x3_same_as_matrix(w):
    """Fold a 3x3 / stride 1 / pad 1 conv into a dense (Cin*H*W, Cout*H*W)
    matrix M such that flatten(conv(x)) == flatten(x) @ M (NCHW flatten)."""
    w = np.asarray(w, dtype=np.float32)
    Cout, Cin = w.shape[0], w.shape[1]
    M = np.zeros((Cin * H * W, Cout * H * W), np.float32)
    for co in range(Cout):
        for ci in range(Cin):
            for kh in range(3):
                for kw in range(3):
                    val = w[co, ci, kh, kw]
                    for oh in range(H):
                        ih = oh + kh - 1
                        if ih < 0 or ih >= H:
                            continue
                        for ow in range(W):
                            iw = ow + kw - 1
                            if iw < 0 or iw >= W:
                                continue
                            M[ci * H * W + ih * W + iw,
                              co * H * W + oh * W + ow] += val
    return M


def _pad2d(a, rows, cols):
    out = np.zeros((rows, cols), np.float32)
    out[:a.shape[0], :a.shape[1]] = a
    return out


def prepare_params(params):
    """One-off prep (off the hot path): fold convs into matmul operands,
    pre-transpose fc1_w, and zero-pad lane dims to multiples of 128.
    Zero padding is exact: padded h1/h2 tail columns stay 0 through ReLU and
    hit zero rows of the next matrix; padded output columns are sliced off."""
    d0 = params["conv1_w"].shape[1] * H * W            # 136
    d1 = params["conv1_w"].shape[0] * H * W            # 272
    d2 = params["conv2_w"].shape[0] * H * W            # 544
    n = params["fc1_w"].shape[0]                       # 34
    d1p, d2p, n_p = _round_up(d1, 128), _round_up(d2, 128), _round_up(n, 128)

    m1 = _conv3x3_same_as_matrix(params["conv1_w"])    # (136, 272)
    m2 = _conv3x3_same_as_matrix(params["conv2_w"])    # (272, 544)
    m3 = np.asarray(params["fc1_w"], np.float32).T     # (544, 34)
    b1 = np.repeat(np.asarray(params["conv1_b"], np.float32), H * W)[None, :]
    b2 = np.repeat(np.asarray(params["conv2_b"], np.float32), H * W)[None, :]
    b3 = np.asarray(params["fc1_b"], np.float32)[None, :]

    return (
        jnp.asarray(_pad2d(m1, d0, d1p)),    # (136, 384)
        jnp.asarray(_pad2d(b1, 1, d1p)),     # (1,   384)
        jnp.asarray(_pad2d(m2, d1p, d2p)),   # (384, 640)
        jnp.asarray(_pad2d(b2, 1, d2p)),     # (1,   640)
        jnp.asarray(_pad2d(m3, d2p, n_p)),   # (640, 128)
        jnp.asarray(_pad2d(b3, 1, n_p)),     # (1,   128)
    )


# --------------------------- pure-JAX reference -----------------------------
def reference_forward(params, x):
    dn = ("NCHW", "OIHW", "NCHW")
    y = jax.lax.conv_general_dilated(x, params["conv1_w"], (1, 1),
                                     ((1, 1), (1, 1)), dimension_numbers=dn)
    y = jax.nn.relu(y + params["conv1_b"][None, :, None, None])
    y = jax.lax.conv_general_dilated(y, params["conv2_w"], (1, 1),
                                     ((1, 1), (1, 1)), dimension_numbers=dn)
    y = jax.nn.relu(y + params["conv2_b"][None, :, None, None])
    y = y.reshape(y.shape[0], -1)
    return y @ params["fc1_w"].T + params["fc1_b"]


if __name__ == "__main__":
    B, Cin = 2, 1
    num_action = 34

    key = jax.random.PRNGKey(0)
    kx, k1, k2, k3, k4, k5, k6 = jax.random.split(key, 7)
    x = jax.random.normal(kx, (B, Cin, H, W), jnp.float32)
    params = {
        "conv1_w": 0.10 * jax.random.normal(k1, (2, Cin, 3, 3), jnp.float32),
        "conv1_b": 0.10 * jax.random.normal(k2, (2,), jnp.float32),
        "conv2_w": 0.10 * jax.random.normal(k3, (4, 2, 3, 3), jnp.float32),
        "conv2_b": 0.10 * jax.random.normal(k4, (4,), jnp.float32),
        "fc1_w": 0.05 * jax.random.normal(k5, (num_action, 4 * H * W), jnp.float32),
        "fc1_b": 0.05 * jax.random.normal(k6, (num_action,), jnp.float32),
    }

    prepared = prepare_params(params)          # one-off, off the forward path
    forward = jax.jit(cnn_forward)             # reshape + 1 fused kernel + slice

    out = jax.block_until_ready(forward(prepared, x))
    ref = jax.block_until_ready(reference_forward(params, x))

    assert out.shape == (B, num_action)
    assert jnp.allclose(out, ref, atol=1e-4, rtol=1e-4)
    print("KERNEL_OK")
</pallas_src>

<mosaic_0001>
module attributes {stable_mosaic.version = 11 : i64} {
  func.func @_fused_cnn_kernel(%arg0: i32, %arg1: memref<2x136xf32, #tpu.memory_space<vmem>>, %arg2: memref<136x384xf32, #tpu.memory_space<vmem>>, %arg3: memref<1x384xf32, #tpu.memory_space<vmem>>, %arg4: memref<384x640xf32, #tpu.memory_space<vmem>>, %arg5: memref<1x640xf32, #tpu.memory_space<vmem>>, %arg6: memref<640x128xf32, #tpu.memory_space<vmem>>, %arg7: memref<1x128xf32, #tpu.memory_space<vmem>>, %arg8: memref<2x128xf32, #tpu.memory_space<vmem>>) attributes {dimension_semantics = [#tpu.dimension_semantics<arbitrary>], iteration_bounds = array<i64: 1>, scalar_prefetch = 0 : i64, scratch_operands = 0 : i64, tpu.core_type = #tpu.core_type<tc>, window_params = [{pipeline_mode = #tpu.pipeline_mode<synchronous>, transform_indices = @transform_0, window_bounds = array<i64: 2, 136>}, {pipeline_mode = #tpu.pipeline_mode<synchronous>, transform_indices = @transform_1, window_bounds = array<i64: 136, 384>}, {pipeline_mode = #tpu.pipeline_mode<synchronous>, transform_indices = @transform_2, window_bounds = array<i64: 1, 384>}, {pipeline_mode = #tpu.pipeline_mode<synchronous>, transform_indices = @transform_3, window_bounds = array<i64: 384, 640>}, {pipeline_mode = #tpu.pipeline_mode<synchronous>, transform_indices = @transform_4, window_bounds = array<i64: 1, 640>}, {pipeline_mode = #tpu.pipeline_mode<synchronous>, transform_indices = @transform_5, window_bounds = array<i64: 640, 128>}, {pipeline_mode = #tpu.pipeline_mode<synchronous>, transform_indices = @transform_6, window_bounds = array<i64: 1, 128>}, {pipeline_mode = #tpu.pipeline_mode<synchronous>, transform_indices = @transform_7, window_bounds = array<i64: 2, 128>}]} {
    %c0 = arith.constant 0 : index
    %c0_0 = arith.constant 0 : index
    %0 = vector.load %arg1[%c0, %c0_0] : memref<2x136xf32, #tpu.memory_space<vmem>>, vector<2x136xf32>
    %c0_1 = arith.constant 0 : index
    %c0_2 = arith.constant 0 : index
    %1 = vector.load %arg2[%c0_1, %c0_2] : memref<136x384xf32, #tpu.memory_space<vmem>>, vector<136x384xf32>
    %cst = arith.constant dense<0.000000e+00> : vector<2x384xf32>
    %2 = tpu.matmul %0, %1, %cst {dimension_numbers = #tpu.dot_dimension_numbers<[1], [0], [0], [1], [0, 0, 1, 1], [], []>} : vector<2x136xf32>, vector<136x384xf32>, vector<2x384xf32> -> vector<2x384xf32>
    %c0_3 = arith.constant 0 : index
    %c0_4 = arith.constant 0 : index
    %3 = vector.load %arg3[%c0_3, %c0_4] : memref<1x384xf32, #tpu.memory_space<vmem>>, vector<1x384xf32>
    %4 = vector.broadcast %3 : vector<1x384xf32> to vector<2x384xf32>
    %5 = arith.addf %2, %4 : vector<2x384xf32>
    %cst_5 = arith.constant 0.000000e+00 : f32
    %6 = vector.broadcast %cst_5 : f32 to vector<2x384xf32>
    %7 = arith.maximumf %5, %6 : vector<2x384xf32>
    %c0_6 = arith.constant 0 : index
    %c0_7 = arith.constant 0 : index
    %8 = vector.load %arg4[%c0_6, %c0_7] : memref<384x640xf32, #tpu.memory_space<vmem>>, vector<384x640xf32>
    %cst_8 = arith.constant dense<0.000000e+00> : vector<2x640xf32>
    %9 = tpu.matmul %7, %8, %cst_8 {dimension_numbers = #tpu.dot_dimension_numbers<[1], [0], [0], [1], [0, 0, 1, 1], [], []>} : vector<2x384xf32>, vector<384x640xf32>, vector<2x640xf32> -> vector<2x640xf32>
    %c0_9 = arith.constant 0 : index
    %c0_10 = arith.constant 0 : index
    %10 = vector.load %arg5[%c0_9, %c0_10] : memref<1x640xf32, #tpu.memory_space<vmem>>, vector<1x640xf32>
    %11 = vector.broadcast %10 : vector<1x640xf32> to vector<2x640xf32>
    %12 = arith.addf %9, %11 : vector<2x640xf32>
    %cst_11 = arith.constant 0.000000e+00 : f32
    %13 = vector.broadcast %cst_11 : f32 to vector<2x640xf32>
    %14 = arith.maximumf %12, %13 : vector<2x640xf32>
    %c0_12 = arith.constant 0 : index
    %c0_13 = arith.constant 0 : index
    %15 = vector.load %arg6[%c0_12, %c0_13] : memref<640x128xf32, #tpu.memory_space<vmem>>, vector<640x128xf32>
    %cst_14 = arith.constant dense<0.000000e+00> : vector<2x128xf32>
    %16 = tpu.matmul %14, %15, %cst_14 {dimension_numbers = #tpu.dot_dimension_numbers<[1], [0], [0], [1], [0, 0, 1, 1], [], []>} : vector<2x640xf32>, vector<640x128xf32>, vector<2x128xf32> -> vector<2x128xf32>
    %c0_15 = arith.constant 0 : index
    %c0_16 = arith.constant 0 : index
    %17 = vector.load %arg7[%c0_15, %c0_16] : memref<1x128xf32, #tpu.memory_space<vmem>>, vector<1x128xf32>
    %18 = vector.broadcast %17 : vector<1x128xf32> to vector<2x128xf32>
    %19 = arith.addf %16, %18 : vector<2x128xf32>
    %c0_17 = arith.constant 0 : index
    %c0_18 = arith.constant 0 : index
    %20 = vector.load %arg8[%c0_17, %c0_18] : memref<2x128xf32, #tpu.memory_space<vmem>>, vector<2x128xf32>
    tpu.vector_store %arg8[%c0_17, %c0_18], %19 {strides = array<i32>} : memref<2x128xf32, #tpu.memory_space<vmem>>, vector<2x128xf32>,
    return
  }
  func.func @transform_0(%arg0: i32) -> (i32, i32) {
    %c0_i32 = arith.constant 0 : i32
    %c0_i32_0 = arith.constant 0 : i32
    %c0_i32_1 = arith.constant 0 : i32
    return %c0_i32, %c0_i32_0 : i32, i32
  }
  func.func @transform_1(%arg0: i32) -> (i32, i32) {
    %c0_i32 = arith.constant 0 : i32
    %c0_i32_0 = arith.constant 0 : i32
    %c0_i32_1 = arith.constant 0 : i32
    return %c0_i32, %c0_i32_0 : i32, i32
  }
  func.func @transform_2(%arg0: i32) -> (i32, i32) {
    %c0_i32 = arith.constant 0 : i32
    %c0_i32_0 = arith.constant 0 : i32
    %c0_i32_1 = arith.constant 0 : i32
    return %c0_i32, %c0_i32_0 : i32, i32
  }
  func.func @transform_3(%arg0: i32) -> (i32, i32) {
    %c0_i32 = arith.constant 0 : i32
    %c0_i32_0 = arith.constant 0 : i32
    %c0_i32_1 = arith.constant 0 : i32
    return %c0_i32, %c0_i32_0 : i32, i32
  }
  func.func @transform_4(%arg0: i32) -> (i32, i32) {
    %c0_i32 = arith.constant 0 : i32
    %c0_i32_0 = arith.constant 0 : i32
    %c0_i32_1 = arith.constant 0 : i32
    return %c0_i32, %c0_i32_0 : i32, i32
  }
  func.func @transform_5(%arg0: i32) -> (i32, i32) {
    %c0_i32 = arith.constant 0 : i32
    %c0_i32_0 = arith.constant 0 : i32
    %c0_i32_1 = arith.constant 0 : i32
    return %c0_i32, %c0_i32_0 : i32, i32
  }
  func.func @transform_6(%arg0: i32) -> (i32, i32) {
    %c0_i32 = arith.constant 0 : i32
    %c0_i32_0 = arith.constant 0 : i32
    %c0_i32_1 = arith.constant 0 : i32
    return %c0_i32, %c0_i32_0 : i32, i32
  }
  func.func @transform_7(%arg0: i32) -> (i32, i32) {
    %c0_i32 = arith.constant 0 : i32
    %c0_i32_0 = arith.constant 0 : i32
    %c0_i32_1 = arith.constant 0 : i32
    return %c0_i32, %c0_i32_0 : i32, i32
  }
}

</mosaic_0001>

<bundles_post_ra>
// kernel: cnn_forward.1
= control target key start
LH: loop header
LB: loop body
LE: loop exit
PB: predicated region body
PF: predicated region fallthrough
CT: control target
= control target key end

     0   :  { %12 = vsyncpa [#allocation3], 0  ;;  %s1246_s0 = inlined_call_operand.vmem [shape: f32[2,136], index: 0, kind: input, shape index: {}]   ;;  %s1247_s1 = inlined_call_operand.hbm [shape: f32[136,384], index: 1, kind: input, shape index: {}]   ;;  %s1248_s2 = inlined_call_operand.vmem [shape: f32[1,384], index: 2, kind: input, shape index: {}]   ;;  %s1249_s3 = inlined_call_operand.hbm [shape: f32[384,640], index: 3, kind: input, shape index: {}]   ;;  %s1250_s4 = inlined_call_operand.vmem [shape: f32[1,640], index: 4, kind: input, shape index: {}]   ;;  %s1251_s5 = inlined_call_operand.hbm [shape: f32[640,128], index: 5, kind: input, shape index: {}]   ;;  %s1252_s6 = inlined_call_operand.vmem [shape: f32[1,128], index: 6, kind: input, shape index: {}]   ;;  %s1253_s7 = inlined_call_operand.hbm [shape: f32[2,128], index: 7, kind: output, shape index: {}]  }
   0x1   :  { %13 = vsyncpa [#allocation6], 0  ;;  %s36_s26 = sshll.u32 %s1249_s3, 4  ;;  %s37_s26 = int_to_ptr.hbm [resolvable:$true] %s36_s26 }
   0x2   :  { %14 = vsyncpa [#allocation4], 0  ;;  %s1141_s27 = smov [#allocation5]   ;;  %s21_s8 = sshll.u32 %s1247_s1, 4  ;;  %s22_s8 = int_to_ptr.hbm [resolvable:$true] %s21_s8 }
   0x3   :  { %s38_s28 = sshll.u32 %s1141_s27, 4  ;;  %s1142_s9 = smov 640   ;;  %s39_s28 = int_to_ptr.vmem [resolvable:$true] %s38_s28 }
   0x4   :  { %s1143_s10 = smov 40   ;;  %s1144_s11 = smov [#allocation2]  }
   0x5   :  { %44 = dma.hbm_to_vmem [thread:$0]  %s37_s26, 30720, %s39_s28, [#allocation6], %s1142_s9, %s1142_s9, %s1143_s10  }
   0x6   :  { %s23_s12 = sshll.u32 %s1144_s11, 4  ;;  %s1145_s13 = smov 384   ;;  %s24_s12 = int_to_ptr.vmem [resolvable:$true] %s23_s12 }
   0x7   :  { %s1146_s14 = smov 24   ;;  %s51_s16 = sshll.u32 %s1251_s5, 4  ;;  %s52_s16 = int_to_ptr.hbm [resolvable:$true] %s51_s16 }
   0x8   :  { %29 = dma.hbm_to_vmem [thread:$0]  %s22_s8, 6528, %s24_s12, [#allocation3], %s1145_s13, %s1145_s13, %s1146_s14  }
   0x9   :  { %s1147_s17 = smov [#allocation7]   ;;  %s1148_s19 = smov 128  }
   0xa   :  { %s53_s18 = sshll.u32 %s1147_s17, 4  ;;  %s1149_s1 = smov 8   ;;  %s54_s18 = int_to_ptr.vmem [resolvable:$true] %s53_s18 }
   0xb   :  { %59 = dma.hbm_to_vmem [thread:$0]  %s52_s16, 10240, %s54_s18, [#allocation6], %s1148_s19, %s1148_s19, %s1149_s1  }
   0xc   :  { %1135 = dma.done.wait [#allocation3], 6528  }
   0xd   :  { %1136 = vsyncadd [#allocation3], 4294960768 }
   0xe   :  { %1137 = dma.done.wait [#allocation6], 40960  }
   0xf   :  { %1138 = vsyncadd [#allocation6], 4294926336  ;;  %v120_v0 = vld [vmem:[#allocation2 + $0x168] sm:$0xff]  ;;  %v121_v1 = vld [vmem:[#allocation2 + $0x170] sm:$0xff]  ;;  %vm139_vm0 = vcmask 64512   ;;  %s1150_s24 = smov [#allocation8]  }
  0x10   :  { %v122_v2 = vld [vmem:[#allocation2 + $0x178] sm:$0xff]  ;;  %142 = vmatpush.msra.mxu0 %v120_v0  ;;  %182 = vmatpush.msra.mxu2 %v121_v1  ;;  %v117_v3 = vld [vmem:[#allocation2 + $0x150] sm:$0xff]  ;;  %v119_v5 = vld [vmem:[#allocation2 + $0x160] sm:$0xff]  ;;  %s1012_s25 = sshll.u32 %s1150_s24, 4  ;;  %s1014_s28 = sshll.u32 %s1253_s7, 4  ;;  %s1013_s25 = int_to_ptr.vmem [resolvable:$true] %s1012_s25  ;;  %s1015_s28 = int_to_ptr.hbm [resolvable:$true] %s1014_s28 }
  0x11   :  { %v118_v4 = vld [vmem:[#allocation2 + $0x158] sm:$0xff]  ;;  %222 = vmatpush.msra.mxu1 %v122_v2  ;;  %v115_v7 = vld [vmem:[#allocation2 + $0x140] sm:$0xff]  ;;  %v116_v8 = vld [vmem:[#allocation2 + $0x148] sm:$0xff] }
  0x12   :  { %v114_v6 = vld [vmem:[#allocation2 + $0x138] sm:$0xff]  ;;  %143 = vmatpush.msra.mxu0 %v117_v3  ;;  %183 = vmatpush.msra.mxu2 %v118_v4  ;;  %v111_v9 = vld [vmem:[#allocation2 + $0x120] sm:$0xff]  ;;  %v112_v10 = vld [vmem:[#allocation2 + $0x128] sm:$0xff] }
  0x13   :  { %223 = vmatpush.msra.mxu1 %v119_v5  ;;  %v113_v11 = vld [vmem:[#allocation2 + $0x130] sm:$0xff]  ;;  %v123_v12 = vld [vmem:[#allocation2 + $0x180] sm:$0xff]  ;;  %v108_v13 = vld [vmem:[#allocation2 + $0x108] sm:$0xff] }
  0x14   :  { %144 = vmatpush.msra.mxu0 %v114_v6  ;;  %184 = vmatpush.msra.mxu2 %v115_v7  ;;  %v109_v14 = vld [vmem:[#allocation2 + $0x110] sm:$0xff]  ;;  %v74_v15 = vld [vmem:[%s1246_s0] sm:$0xf]  ;;  %v107_v19 = vld [vmem:[#allocation2 + $0x100] sm:$0xff] }
  0x15   :  { %224 = vmatpush.msra.mxu1 %v116_v8  ;;  %177 = vmatpush.msra.mxu3 %v123_v12  ;;  %v110_v16 = vld [vmem:[#allocation2 + $0x118] sm:$0xff]  ;;  %135 = vst [vmem:[#allocation1] ss:$4 sm:$0xff] %v74_v15  ;;  %v105_v17 = vld [vmem:[#allocation2 + $0xf0] sm:$0xff]  ;;  %v103_v21 = vld [vmem:[#allocation2 + $0xe0] sm:$0xff] }
  0x16   :  { %145 = vmatpush.msra.mxu0 %v111_v9  ;;  %185 = vmatpush.msra.mxu2 %v112_v10  ;;  %v106_v18 = vld [vmem:[#allocation2 + $0xf8] sm:$0xff]  ;;  %v124_v22 = vld [vmem:[#allocation2 + $0x188] sm:$0xff]  ;;  %v99_v24 = vld [vmem:[#allocation2 + $0xc0] sm:$0xff] }
  0x17   :  { %225 = vmatpush.msra.mxu1 %v113_v11  ;;  %v102_v20 = vld [vmem:[#allocation2 + $0xd8] sm:$0xff]  ;;  %v104_v23 = vld [vmem:[#allocation2 + $0xe8] sm:$0xff]  ;;  %217 = vmatpush.msrb.mxu3 %v124_v22  ;;  %v101_v26 = vld [vmem:[#allocation2 + $0xd0] sm:$0xff] }
  0x18   :  { %146 = vmatpush.msra.mxu0 %v108_v13  ;;  %186 = vmatpush.msra.mxu2 %v109_v14  ;;  %v100_v25 = vld [vmem:[#allocation2 + $0xc8] sm:$0xff]  ;;  %v97_v29 = vld [vmem:[#allocation2 + $0xb0] sm:$0xff]  ;;  %v98_v30 = vld [vmem:[#allocation2 + $0xb8] sm:$0xff] }
  0x19   :  { %226 = vmatpush.msra.mxu1 %v110_v16  ;;  %v96_v28 = vld [vmem:[#allocation2 + $0xa8] sm:$0xff]  ;;  %v125_v31 = vld [vmem:[#allocation2 + $0x190] sm:$0xff]  ;;  %v94_v33 = vld [vmem:[#allocation2 + $0x98] sm:$0xff] }
  0x1a   :  { %147 = vmatpush.msra.mxu0 %v105_v17  ;;  %187 = vmatpush.msra.mxu2 %v106_v18  ;;  %v93_v32 = vld [vmem:[#allocation2 + $0x90] sm:$0xff]  ;;  %v95_v34 = vld [vmem:[#allocation2 + $0xa0] sm:$0xff]  ;;  %v90_v35 = vld [vmem:[#allocation2 + $0x78] sm:$0xff] }
  0x1b   :  { %227 = vmatpush.msra.mxu1 %v107_v19  ;;  %v91_v36 = vld [vmem:[#allocation2 + $0x80] sm:$0xff]  ;;  %v92_v37 = vld [vmem:[#allocation2 + $0x88] sm:$0xff]  ;;  %v89_v40 = vld [vmem:[#allocation2 + $0x70] sm:$0xff] }
  0x1c   :  { %148 = vmatpush.msra.mxu0 %v102_v20  ;;  %188 = vmatpush.msra.mxu2 %v103_v21  ;;  %v137_v27 = vld.sshfl [vmem:[#allocation1 + $0x8] sm:$0xff pattern:$0x73625140]  ;;  %v88_v39 = vld [vmem:[#allocation2 + $0x68] sm:$0xff]  ;;  %v340_v42 = vld [vmem:[#allocation5 + $0x258] sm:$0xff] }
  0x1d   :  { %228 = vmatpush.msra.mxu1 %v104_v23  ;;  %1025 = vmatmul.msk.f32.vlgmr.msra.gmra.mxu3 %vm139_vm0, %v137_v27  ;;  %v87_v38 = vld [vmem:[#allocation2 + $0x60] sm:$0xff]  ;;  %v84_v41 = vld [vmem:[#allocation2 + $0x48] sm:$0xff]  ;;  %v85_v43 = vld [vmem:[#allocation2 + $0x50] sm:$0xff] }
  0x1e   :  { %149 = vmatpush.msra.mxu0 %v99_v24  ;;  %189 = vmatpush.msra.mxu2 %v100_v25  ;;  %v86_v44 = vld [vmem:[#allocation2 + $0x58] sm:$0xff]  ;;  %v81_v45 = vld [vmem:[#allocation2 + $0x30] sm:$0xff]  ;;  %v335_v46 = vld [vmem:[#allocation5 + $0x230] sm:$0xff] }
  0x1f   :  { %229 = vmatpush.msra.mxu1 %v101_v26  ;;  %257 = vmatpush.msra.mxu3 %v125_v31  ;;  %v82_v47 = vld [vmem:[#allocation2 + $0x38] sm:$0xff]  ;;  %v83_v48 = vld [vmem:[#allocation2 + $0x40] sm:$0xff]  ;;  %v80_v52 = vld [vmem:[#allocation2 + $0x28] sm:$0xff] }
  0x20   :  { %150 = vmatpush.msra.mxu0 %v96_v28  ;;  %190 = vmatpush.msra.mxu2 %v97_v29  ;;  %v78_v49 = vld [vmem:[#allocation2 + $0x18] sm:$0xff]  ;;  %v330_v50 = vld [vmem:[#allocation5 + $0x208] sm:$0xff]  ;;  %v76_v54 = vld [vmem:[#allocation2 + $0x8] sm:$0xff] }
  0x21   :  { %230 = vmatpush.msra.mxu1 %v98_v30  ;;  %v79_v51 = vld [vmem:[#allocation2 + $0x20] sm:$0xff]  ;;  %v77_v55 = vld [vmem:[#allocation2 + $0x10] sm:$0xff]  ;;  %v136_v56 = vld.sshfl [vmem:[#allocation1] sm:$0xff pattern:$0x73625140] }
  0x22   :  { %151 = vmatpush.msra.mxu0 %v93_v32  ;;  %191 = vmatpush.msra.mxu2 %v94_v33  ;;  %v75_v53 = vld [vmem:[#allocation2] sm:$0xff]  ;;  %v500_v57 = vld [vmem:[#allocation5 + $0x758] sm:$0xff]  ;;  %v341_v58 = vld [vmem:[#allocation5 + $0x260] sm:$0xff] }
  0x23   :  { %231 = vmatpush.msra.mxu1 %v95_v34  ;;  %v325_v59 = vld [vmem:[#allocation5 + $0x1e0] sm:$0xff]  ;;  %v495_v60 = vld [vmem:[#allocation5 + $0x730] sm:$0xff]  ;;  %v420_v61 = vld [vmem:[#allocation5 + $0x4d8] sm:$0xff] }
  0x24   :  { %152 = vmatpush.msra.mxu0 %v90_v35  ;;  %192 = vmatpush.msra.mxu2 %v91_v36  ;;  %v336_v62 = vld [vmem:[#allocation5 + $0x238] sm:$0xff]  ;;  %v490_v0 = vld [vmem:[#allocation5 + $0x708] sm:$0xff]  ;;  %v415_v1 = vld [vmem:[#allocation5 + $0x4b0] sm:$0xff] }
  0x25   :  { %232 = vmatpush.msra.mxu1 %v92_v37  ;;  %1026 = vmatmul.msk.f32.vlgmr.msrb.gmra.mxu3 %vm139_vm0, %v137_v27  ;;  %v320_v63 = vld [vmem:[#allocation5 + $0x1b8] sm:$0xff]  ;;  %v331_v2 = vld [vmem:[#allocation5 + $0x210] sm:$0xff]  ;;  %v485_v4 = vld [vmem:[#allocation5 + $0x6e0] sm:$0xff] }
  0x26   :  { %153 = vmatpush.msra.mxu0 %v87_v38  ;;  %193 = vmatpush.msra.mxu2 %v88_v39  ;;  %v315_v3 = vld [vmem:[#allocation5 + $0x190] sm:$0xff]  ;;  %v410_v5 = vld [vmem:[#allocation5 + $0x488] sm:$0xff]  ;;  %v480_v8 = vld [vmem:[#allocation5 + $0x6b8] sm:$0xff] }
  0x27   :  { %233 = vmatpush.msra.mxu1 %v89_v40  ;;  %517 = vmatpush.msrb.mxu3 %v340_v42  ;;  %v326_v6 = vld [vmem:[#allocation5 + $0x1e8] sm:$0xff]  ;;  %v405_v9 = vld [vmem:[#allocation5 + $0x460] sm:$0xff]  ;;  %v475_v12 = vld [vmem:[#allocation5 + $0x690] sm:$0xff] }
  0x28   :  { %154 = vmatpush.msra.mxu0 %v84_v41  ;;  %194 = vmatpush.msra.mxu2 %v85_v43  ;;  %v310_v7 = vld [vmem:[#allocation5 + $0x168] sm:$0xff]  ;;  %v321_v10 = vld [vmem:[#allocation5 + $0x1c0] sm:$0xff]  ;;  %v400_v13 = vld [vmem:[#allocation5 + $0x438] sm:$0xff] }
  0x29   :  { %234 = vmatpush.msra.mxu1 %v86_v44  ;;  %518 = vmatpush.msrb.mxu3 %v335_v46  ;;  %v305_v11 = vld [vmem:[#allocation5 + $0x140] sm:$0xff]  ;;  %v316_v14 = vld [vmem:[#allocation5 + $0x198] sm:$0xff]  ;;  %v470_v16 = vld [vmem:[#allocation5 + $0x668] sm:$0xff] }
  0x2a   :  { %155 = vmatpush.msra.mxu0 %v81_v45  ;;  %195 = vmatpush.msra.mxu2 %v82_v47  ;;  %v300_v15 = vld [vmem:[#allocation5 + $0x118] sm:$0xff]  ;;  %v395_v17 = vld [vmem:[#allocation5 + $0x410] sm:$0xff]  ;;  %v465_v20 = vld [vmem:[#allocation5 + $0x640] sm:$0xff] }
  0x2b   :  { %235 = vmatpush.msra.mxu1 %v83_v48  ;;  %519 = vmatpush.msrb.mxu3 %v330_v50  ;;  %v311_v18 = vld [vmem:[#allocation5 + $0x170] sm:$0xff]  ;;  %v390_v21 = vld [vmem:[#allocation5 + $0x3e8] sm:$0xff]  ;;  %v460_v24 = vld [vmem:[#allocation5 + $0x618] sm:$0xff] }
  0x2c   :  { %156 = vmatpush.msra.mxu0 %v78_v49  ;;  %196 = vmatpush.msra.mxu2 %v79_v51  ;;  %v295_v19 = vld [vmem:[#allocation5 + $0xf0] sm:$0xff]  ;;  %v306_v22 = vld [vmem:[#allocation5 + $0x148] sm:$0xff]  ;;  %v385_v25 = vld [vmem:[#allocation5 + $0x3c0] sm:$0xff] }
  0x2d   :  { %236 = vmatpush.msra.mxu1 %v80_v52  ;;  %1027 = vmatmul.msk.f32.vlgmr.msra.gmra.mxu3 %vm139_vm0, %v137_v27  ;;  %v290_v23 = vld [vmem:[#allocation5 + $0xc8] sm:$0xff]  ;;  %v301_v26 = vld [vmem:[#allocation5 + $0x120] sm:$0xff]  ;;  %v455_v28 = vld [vmem:[#allocation5 + $0x5f0] sm:$0xff] }
  0x2e   :  { %157 = vmatpush.msra.mxu0 %v75_v53  ;;  %197 = vmatpush.msra.mxu2 %v76_v54  ;;  %v285_v27 = vld [vmem:[#allocation5 + $0xa0] sm:$0xff]  ;;  %v380_v29 = vld [vmem:[#allocation5 + $0x398] sm:$0xff]  ;;  %v450_v32 = vld [vmem:[#allocation5 + $0x5c8] sm:$0xff] }
  0x2f   :  { %237 = vmatpush.msra.mxu1 %v77_v55  ;;  %158 = vmatmul.f32.vlgmr.msra.gmra.mxu0 %v136_v56  ;;  %v296_v30 = vld [vmem:[#allocation5 + $0xf8] sm:$0xff]  ;;  %v375_v33 = vld [vmem:[#allocation5 + $0x370] sm:$0xff]  ;;  %v445_v36 = vld [vmem:[#allocation5 + $0x5a0] sm:$0xff] }
  0x30   :  { %198 = vmatmul.f32.vlgmr.msra.gmra.mxu2 %v136_v56  ;;  %238 = vmatmul.f32.vlgmr.msra.gmra.mxu1 %v136_v56  ;;  %v280_v31 = vld [vmem:[#allocation5 + $0x78] sm:$0xff]  ;;  %v291_v34 = vld [vmem:[#allocation5 + $0xd0] sm:$0xff]  ;;  %v370_v37 = vld [vmem:[#allocation5 + $0x348] sm:$0xff] }
  0x31   :  { %557 = vmatpush.msrb.mxu2 %v500_v57  ;;  %577 = vmatpush.msrb.mxu1 %v341_v58  ;;  %v275_v35 = vld [vmem:[#allocation5 + $0x50] sm:$0xff]  ;;  %v286_v38 = vld [vmem:[#allocation5 + $0xa8] sm:$0xff]  ;;  %v440_v40 = vld [vmem:[#allocation5 + $0x578] sm:$0xff] }
  0x32   :  { %520 = vmatpush.msrb.mxu3 %v325_v59  ;;  %537 = vmatpush.msrb.mxu0 %v420_v61  ;;  %v270_v39 = vld [vmem:[#allocation5 + $0x28] sm:$0xff]  ;;  %v365_v41 = vld [vmem:[#allocation5 + $0x320] sm:$0xff]  ;;  %v435_v44 = vld [vmem:[#allocation5 + $0x550] sm:$0xff] }
  0x33   :  { %558 = vmatpush.msrb.mxu2 %v495_v60  ;;  %578 = vmatpush.msrb.mxu1 %v336_v62  ;;  %v281_v42 = vld [vmem:[#allocation5 + $0x80] sm:$0xff]  ;;  %v360_v45 = vld [vmem:[#allocation5 + $0x2f8] sm:$0xff]  ;;  %v430_v48 = vld [vmem:[#allocation5 + $0x528] sm:$0xff] }
  0x34   :  { %521 = vmatpush.msrb.mxu3 %v320_v63  ;;  %538 = vmatpush.msrb.mxu0 %v415_v1  ;;  %v265_v43 = vld [vmem:[#allocation5] sm:$0xff]  ;;  %v276_v46 = vld [vmem:[#allocation5 + $0x58] sm:$0xff]  ;;  %v355_v49 = vld [vmem:[#allocation5 + $0x2d0] sm:$0xff] }
  0x35   :  { %559 = vmatpush.msrb.mxu2 %v490_v0  ;;  %579 = vmatpush.msrb.mxu1 %v331_v2  ;;  %v421_v47 = vld [vmem:[#allocation5 + $0x4e0] sm:$0xff]  ;;  %v271_v50 = vld [vmem:[#allocation5 + $0x30] sm:$0xff]  ;;  %v416_v51 = vld [vmem:[#allocation5 + $0x4b8] sm:$0xff] }
  0x36   :  { %522 = vmatpush.msrb.mxu3 %v315_v3  ;;  %539 = vmatpush.msrb.mxu0 %v410_v5  ;;  %v425_v52 = vld [vmem:[#allocation5 + $0x500] sm:$0xff]  ;;  %v350_v53 = vld [vmem:[#allocation5 + $0x2a8] sm:$0xff]  ;;  %v411_v57 = vld [vmem:[#allocation5 + $0x490] sm:$0xff] }
  0x37   :  { %560 = vmatpush.msrb.mxu2 %v485_v4  ;;  %580 = vmatpush.msrb.mxu1 %v326_v6  ;;  %v266_v54 = vld [vmem:[#allocation5 + $0x8] sm:$0xff]  ;;  %v337_v58 = vld [vmem:[#allocation5 + $0x240] sm:$0xff]  ;;  %v332_v62 = vld [vmem:[#allocation5 + $0x218] sm:$0xff] }
  0x38   :  { %523 = vmatpush.msrb.mxu3 %v310_v7  ;;  %540 = vmatpush.msrb.mxu0 %v405_v9  ;;  %v342_v55 = vld [vmem:[#allocation5 + $0x268] sm:$0xff]  ;;  %v345_v59 = vld [vmem:[#allocation5 + $0x280] sm:$0xff]  ;;  %v412_v0 = vld [vmem:[#allocation5 + $0x498] sm:$0xff] }
  0x39   :  { %561 = vmatpush.msrb.mxu2 %v480_v8  ;;  %581 = vmatpush.msrb.mxu1 %v321_v10  ;;  %v422_v56 = vld [vmem:[#allocation5 + $0x4e8] sm:$0xff]  ;;  %v417_v60 = vld [vmem:[#allocation5 + $0x4c0] sm:$0xff]  ;;  %v327_v2 = vld [vmem:[#allocation5 + $0x1f0] sm:$0xff] }
  0x3a   :  { %524 = vmatpush.msrb.mxu3 %v305_v11  ;;  %541 = vmatpush.msrb.mxu0 %v400_v13  ;;  %v406_v61 = vld [vmem:[#allocation5 + $0x468] sm:$0xff]  ;;  %v501_v63 = vld [vmem:[#allocation5 + $0x760] sm:$0xff]  ;;  %v496_v3 = vld [vmem:[#allocation5 + $0x738] sm:$0xff] }
  0x3b   :  { %562 = vmatpush.msrb.mxu2 %v475_v12  ;;  %582 = vmatpush.msrb.mxu1 %v316_v14  ;;  %v401_v1 = vld [vmem:[#allocation5 + $0x440] sm:$0xff]  ;;  %v407_v4 = vld [vmem:[#allocation5 + $0x470] sm:$0xff]  ;;  %v322_v5 = vld [vmem:[#allocation5 + $0x1c8] sm:$0xff] }
  0x3c   :  { %525 = vmatpush.msrb.mxu3 %v300_v15  ;;  %542 = vmatpush.msrb.mxu0 %v395_v17  ;;  %v402_v6 = vld [vmem:[#allocation5 + $0x448] sm:$0xff]  ;;  %v396_v7 = vld [vmem:[#allocation5 + $0x418] sm:$0xff]  ;;  %v491_v8 = vld [vmem:[#allocation5 + $0x710] sm:$0xff] }
  0x3d   :  { %563 = vmatpush.msrb.mxu2 %v470_v16  ;;  %583 = vmatpush.msrb.mxu1 %v311_v18  ;;  %v317_v9 = vld [vmem:[#allocation5 + $0x1a0] sm:$0xff]  ;;  %v391_v11 = vld [vmem:[#allocation5 + $0x3f0] sm:$0xff]  ;;  %v486_v12 = vld [vmem:[#allocation5 + $0x6e8] sm:$0xff] }
  0x3e   :  { %526 = vmatpush.msrb.mxu3 %v295_v19  ;;  %543 = vmatpush.msrb.mxu0 %v390_v21  ;;  %v397_v10 = vld [vmem:[#allocation5 + $0x420] sm:$0xff]  ;;  %v312_v13 = vld [vmem:[#allocation5 + $0x178] sm:$0xff]  ;;  %v386_v15 = vld [vmem:[#allocation5 + $0x3c8] sm:$0xff] }
  0x3f   :  { %564 = vmatpush.msrb.mxu2 %v465_v20  ;;  %584 = vmatpush.msrb.mxu1 %v306_v22  ;;  %v392_v14 = vld [vmem:[#allocation5 + $0x3f8] sm:$0xff]  ;;  %v481_v16 = vld [vmem:[#allocation5 + $0x6c0] sm:$0xff]  ;;  %v307_v17 = vld [vmem:[#allocation5 + $0x150] sm:$0xff] }
  0x40   :  { %527 = vmatpush.msrb.mxu3 %v290_v23  ;;  %544 = vmatpush.msrb.mxu0 %v385_v25  ;;  %v387_v18 = vld [vmem:[#allocation5 + $0x3d0] sm:$0xff]  ;;  %v381_v19 = vld [vmem:[#allocation5 + $0x3a0] sm:$0xff]  ;;  %v476_v20 = vld [vmem:[#allocation5 + $0x698] sm:$0xff] }
  0x41   :  { %565 = vmatpush.msrb.mxu2 %v460_v24  ;;  %585 = vmatpush.msrb.mxu1 %v301_v26  ;;  %v302_v21 = vld [vmem:[#allocation5 + $0x128] sm:$0xff]  ;;  %v376_v23 = vld [vmem:[#allocation5 + $0x378] sm:$0xff]  ;;  %v471_v24 = vld [vmem:[#allocation5 + $0x670] sm:$0xff] }
  0x42   :  { %528 = vmatpush.msrb.mxu3 %v285_v27  ;;  %545 = vmatpush.msrb.mxu0 %v380_v29  ;;  %v382_v22 = vld [vmem:[#allocation5 + $0x3a8] sm:$0xff]  ;;  %v297_v25 = vld [vmem:[#allocation5 + $0x100] sm:$0xff]  ;;  %v371_v27 = vld [vmem:[#allocation5 + $0x350] sm:$0xff] }
  0x43   :  { %566 = vmatpush.msrb.mxu2 %v455_v28  ;;  %586 = vmatpush.msrb.mxu1 %v296_v30  ;;  %v377_v26 = vld [vmem:[#allocation5 + $0x380] sm:$0xff]  ;;  %v466_v28 = vld [vmem:[#allocation5 + $0x648] sm:$0xff]  ;;  %v292_v29 = vld [vmem:[#allocation5 + $0xd8] sm:$0xff] }
  0x44   :  { %529 = vmatpush.msrb.mxu3 %v280_v31  ;;  %546 = vmatpush.msrb.mxu0 %v375_v33  ;;  %v372_v30 = vld [vmem:[#allocation5 + $0x358] sm:$0xff]  ;;  %v366_v31 = vld [vmem:[#allocation5 + $0x328] sm:$0xff]  ;;  %v287_v33 = vld [vmem:[#allocation5 + $0xb0] sm:$0xff] }
  0x45   :  { %567 = vmatpush.msrb.mxu2 %v450_v32  ;;  %587 = vmatpush.msrb.mxu1 %v291_v34  ;;  %v461_v32 = vld [vmem:[#allocation5 + $0x620] sm:$0xff]  ;;  %v367_v34 = vld [vmem:[#allocation5 + $0x330] sm:$0xff] }
  0x46   :  { %530 = vmatpush.msrb.mxu3 %v275_v35  ;;  %547 = vmatpush.msrb.mxu0 %v370_v37  ;;  %v361_v35 = vld [vmem:[#allocation5 + $0x300] sm:$0xff]  ;;  %v282_v37 = vld [vmem:[#allocation5 + $0x88] sm:$0xff] }
  0x47   :  { %568 = vmatpush.msrb.mxu2 %v445_v36  ;;  %588 = vmatpush.msrb.mxu1 %v286_v38  ;;  %v456_v36 = vld [vmem:[#allocation5 + $0x5f8] sm:$0xff]  ;;  %v362_v38 = vld [vmem:[#allocation5 + $0x308] sm:$0xff] }
  0x48   :  { %531 = vmatpush.msrb.mxu3 %v270_v39  ;;  %548 = vmatpush.msrb.mxu0 %v365_v41  ;;  %v356_v39 = vld [vmem:[#allocation5 + $0x2d8] sm:$0xff]  ;;  %v277_v41 = vld [vmem:[#allocation5 + $0x60] sm:$0xff] }
  0x49   :  { %569 = vmatpush.msrb.mxu2 %v440_v40  ;;  %589 = vmatpush.msrb.mxu1 %v281_v42  ;;  %v451_v40 = vld [vmem:[#allocation5 + $0x5d0] sm:$0xff]  ;;  %v357_v42 = vld [vmem:[#allocation5 + $0x2e0] sm:$0xff] }
  0x4a   :  { %532 = vmatpush.msrb.mxu3 %v265_v43  ;;  %549 = vmatpush.msrb.mxu0 %v360_v45  ;;  %v351_v43 = vld [vmem:[#allocation5 + $0x2b0] sm:$0xff]  ;;  %v272_v45 = vld [vmem:[#allocation5 + $0x38] sm:$0xff] }
  0x4b   :  { %570 = vmatpush.msrb.mxu2 %v435_v44  ;;  %590 = vmatpush.msrb.mxu1 %v276_v46  ;;  %v446_v44 = vld [vmem:[#allocation5 + $0x5a8] sm:$0xff]  ;;  %v352_v46 = vld [vmem:[#allocation5 + $0x2b8] sm:$0xff] }
  0x4c   :  { %597 = vmatpush.msra.mxu3 %v421_v47  ;;  %550 = vmatpush.msrb.mxu0 %v355_v49  ;;  %v346_v47 = vld [vmem:[#allocation5 + $0x288] sm:$0xff]  ;;  %v267_v49 = vld [vmem:[#allocation5 + $0x10] sm:$0xff] }
  0x4d   :  { %571 = vmatpush.msrb.mxu2 %v430_v48  ;;  %591 = vmatpush.msrb.mxu1 %v271_v50  ;;  %v441_v48 = vld [vmem:[#allocation5 + $0x580] sm:$0xff]  ;;  %v347_v50 = vld [vmem:[#allocation5 + $0x290] sm:$0xff] }
  0x4e   :  { %598 = vmatpush.msra.mxu3 %v416_v51  ;;  %551 = vmatpush.msrb.mxu0 %v350_v53  ;;  %v436_v51 = vld [vmem:[#allocation5 + $0x558] sm:$0xff]  ;;  %v426_v53 = vld [vmem:[#allocation5 + $0x508] sm:$0xff] }
  0x4f   :  { %572 = vmatpush.msrb.mxu2 %v425_v52  ;;  %592 = vmatpush.msrb.mxu1 %v266_v54  ;;  %v431_v52 = vld [vmem:[#allocation5 + $0x530] sm:$0xff] }
  0x50   :  { %599 = vmatpush.msra.mxu3 %v411_v57  ;;  %552 = vmatpush.msrb.mxu0 %v345_v59 }
  0x51   :  { %637 = vmatpush.msra.mxu2 %v342_v55  ;;  %657 = vmatpush.msra.mxu1 %v422_v56  ;;  %v126_v55 = vld [vmem:[%s1248_s2] sm:$0x7] }
  0x52   :  { %600 = vmatpush.msra.mxu3 %v406_v61  ;;  %617 = vmatpush.msra.mxu0 %v501_v63  ;;  %v128_v57 = vperm.slane %v126_v55, 0 }
  0x53   :  { %638 = vmatpush.msra.mxu2 %v337_v58  ;;  %658 = vmatpush.msra.mxu1 %v417_v60  ;;  %v130_v58 = vperm.slane %v126_v55, 2 }
  0x54   :  { %601 = vmatpush.msra.mxu3 %v401_v1  ;;  %618 = vmatpush.msra.mxu0 %v496_v3 }
  0x55   :  { %639 = vmatpush.msra.mxu2 %v332_v62  ;;  %659 = vmatpush.msra.mxu1 %v412_v0  ;;  %v129_v0 = vperm.slane %v126_v55, 1  ;;  %v298_v55 = vld [vmem:[#allocation5 + $0x108] sm:$0xff] }
  0x56   :  { %602 = vmatpush.msra.mxu3 %v396_v7  ;;  %619 = vmatpush.msra.mxu0 %v491_v8 }
  0x57   :  { %640 = vmatpush.msra.mxu2 %v327_v2  ;;  %660 = vmatpush.msra.mxu1 %v407_v4  ;;  %v502_v4 = vld [vmem:[#allocation5 + $0x768] sm:$0xff] }
  0x58   :  { %603 = vmatpush.msra.mxu3 %v391_v11  ;;  %620 = vmatpush.msra.mxu0 %v486_v12  ;;  %v498_v11 = vld [vmem:[#allocation5 + $0x748] sm:$0xff] }
  0x59   :  { %641 = vmatpush.msra.mxu2 %v322_v5  ;;  %661 = vmatpush.msra.mxu1 %v402_v6  ;;  %v503_v5 = vld [vmem:[#allocation5 + $0x770] sm:$0xff] }
  0x5a   :  { %604 = vmatpush.msra.mxu3 %v386_v15  ;;  %621 = vmatpush.msra.mxu0 %v481_v16  ;;  %v493_v15 = vld [vmem:[#allocation5 + $0x720] sm:$0xff] }
  0x5b   :  { %642 = vmatpush.msra.mxu2 %v317_v9  ;;  %662 = vmatpush.msra.mxu1 %v397_v10  ;;  %v423_v9 = vld [vmem:[#allocation5 + $0x4f0] sm:$0xff]  ;;  %v497_v10 = vld [vmem:[#allocation5 + $0x740] sm:$0xff] }
  0x5c   :  { %605 = vmatpush.msra.mxu3 %v381_v19  ;;  %622 = vmatpush.msra.mxu0 %v476_v20  ;;  %v343_v19 = vld [vmem:[#allocation5 + $0x270] sm:$0xff]  ;;  %v488_v20 = vld [vmem:[#allocation5 + $0x6f8] sm:$0xff] }
  0x5d   :  { %643 = vmatpush.msra.mxu2 %v312_v13  ;;  %663 = vmatpush.msra.mxu1 %v392_v14  ;;  %v418_v13 = vld [vmem:[#allocation5 + $0x4c8] sm:$0xff]  ;;  %v492_v14 = vld [vmem:[#allocation5 + $0x718] sm:$0xff] }
  0x5e   :  { %606 = vmatpush.msra.mxu3 %v376_v23  ;;  %623 = vmatpush.msra.mxu0 %v471_v24  ;;  %v338_v23 = vld [vmem:[#allocation5 + $0x248] sm:$0xff]  ;;  %v403_v24 = vld [vmem:[#allocation5 + $0x450] sm:$0xff] }
  0x5f   :  { %644 = vmatpush.msra.mxu2 %v307_v17  ;;  %664 = vmatpush.msra.mxu1 %v387_v18  ;;  %v413_v17 = vld [vmem:[#allocation5 + $0x4a0] sm:$0xff]  ;;  %v487_v18 = vld [vmem:[#allocation5 + $0x6f0] sm:$0xff] }
  0x60   :  { %607 = vmatpush.msra.mxu3 %v371_v27  ;;  %624 = vmatpush.msra.mxu0 %v466_v28  ;;  %v333_v27 = vld [vmem:[#allocation5 + $0x220] sm:$0xff]  ;;  %v398_v28 = vld [vmem:[#allocation5 + $0x428] sm:$0xff] }
  0x61   :  { %645 = vmatpush.msra.mxu2 %v302_v21  ;;  %665 = vmatpush.msra.mxu1 %v382_v22  ;;  %v408_v21 = vld [vmem:[#allocation5 + $0x478] sm:$0xff]  ;;  %v482_v22 = vld [vmem:[#allocation5 + $0x6c8] sm:$0xff] }
  0x62   :  { %608 = vmatpush.msra.mxu3 %v366_v31  ;;  %625 = vmatpush.msra.mxu0 %v461_v32  ;;  %v328_v31 = vld [vmem:[#allocation5 + $0x1f8] sm:$0xff]  ;;  %v393_v32 = vld [vmem:[#allocation5 + $0x400] sm:$0xff] }
  0x63   :  { %646 = vmatpush.msra.mxu2 %v297_v25  ;;  %666 = vmatpush.msra.mxu1 %v377_v26  ;;  %v483_v25 = vld [vmem:[#allocation5 + $0x6d0] sm:$0xff]  ;;  %v477_v26 = vld [vmem:[#allocation5 + $0x6a0] sm:$0xff] }
  0x64   :  { %609 = vmatpush.msra.mxu3 %v361_v35  ;;  %626 = vmatpush.msra.mxu0 %v456_v36  ;;  %v323_v35 = vld [vmem:[#allocation5 + $0x1d0] sm:$0xff]  ;;  %v388_v36 = vld [vmem:[#allocation5 + $0x3d8] sm:$0xff] }
  0x65   :  { %647 = vmatpush.msra.mxu2 %v292_v29  ;;  %667 = vmatpush.msra.mxu1 %v372_v30  ;;  %v478_v29 = vld [vmem:[#allocation5 + $0x6a8] sm:$0xff]  ;;  %v472_v30 = vld [vmem:[#allocation5 + $0x678] sm:$0xff] }
  0x66   :  { %610 = vmatpush.msra.mxu3 %v356_v39  ;;  %627 = vmatpush.msra.mxu0 %v451_v40  ;;  %v318_v39 = vld [vmem:[#allocation5 + $0x1a8] sm:$0xff]  ;;  %v383_v40 = vld [vmem:[#allocation5 + $0x3b0] sm:$0xff] }
  0x67   :  { %648 = vmatpush.msra.mxu2 %v287_v33  ;;  %668 = vmatpush.msra.mxu1 %v367_v34  ;;  %v473_v33 = vld [vmem:[#allocation5 + $0x680] sm:$0xff]  ;;  %v467_v34 = vld [vmem:[#allocation5 + $0x650] sm:$0xff] }
  0x68   :  { %611 = vmatpush.msra.mxu3 %v351_v43  ;;  %628 = vmatpush.msra.mxu0 %v446_v44  ;;  %v313_v43 = vld [vmem:[#allocation5 + $0x180] sm:$0xff]  ;;  %v378_v44 = vld [vmem:[#allocation5 + $0x388] sm:$0xff] }
  0x69   :  { %649 = vmatpush.msra.mxu2 %v282_v37  ;;  %669 = vmatpush.msra.mxu1 %v362_v38  ;;  %v468_v37 = vld [vmem:[#allocation5 + $0x658] sm:$0xff]  ;;  %v462_v38 = vld [vmem:[#allocation5 + $0x628] sm:$0xff] }
  0x6a   :  { %612 = vmatpush.msra.mxu3 %v346_v47  ;;  %629 = vmatpush.msra.mxu0 %v441_v48  ;;  %v308_v47 = vld [vmem:[#allocation5 + $0x158] sm:$0xff]  ;;  %v373_v48 = vld [vmem:[#allocation5 + $0x360] sm:$0xff] }
  0x6b   :  { %650 = vmatpush.msra.mxu2 %v277_v41  ;;  %670 = vmatpush.msra.mxu1 %v357_v42  ;;  %v463_v41 = vld [vmem:[#allocation5 + $0x630] sm:$0xff]  ;;  %v457_v42 = vld [vmem:[#allocation5 + $0x600] sm:$0xff] }
  0x6c   :  { %630 = vmatpush.msra.mxu0 %v436_v51  ;;  %v303_v51 = vld [vmem:[#allocation5 + $0x130] sm:$0xff] }
  0x6d   :  { %651 = vmatpush.msra.mxu2 %v272_v45  ;;  %671 = vmatpush.msra.mxu1 %v352_v46  ;;  %v458_v45 = vld [vmem:[#allocation5 + $0x608] sm:$0xff]  ;;  %v452_v46 = vld [vmem:[#allocation5 + $0x5d8] sm:$0xff] }
  0x6e   :  { %631 = vmatpush.msra.mxu0 %v431_v52  ;;  %v368_v52 = vld [vmem:[#allocation5 + $0x338] sm:$0xff] }
  0x6f   :  { %652 = vmatpush.msra.mxu2 %v267_v49  ;;  %672 = vmatpush.msra.mxu1 %v347_v50  ;;  %v453_v49 = vld [vmem:[#allocation5 + $0x5e0] sm:$0xff]  ;;  %v447_v50 = vld [vmem:[#allocation5 + $0x5b0] sm:$0xff] }
  0x70   :  { %632 = vmatpush.msra.mxu0 %v426_v53  ;;  %v448_v53 = vld [vmem:[#allocation5 + $0x5b8] sm:$0xff] }
  0xa0   :  { %v179_v54 = vpop.f32.mrf.mxu3 }
  0xa8   :  { %v219_v56 = vpop.f32.mrf.mxu3 }
  0xac   :  { %v159_v59 = vpop.f32.mrf.mxu0 }
  0xad   :  { %v160_v60 = vadd.f32 %v159_v59, %v128_v57  ;;  %v239_v61 = vpop.f32.mrf.mxu1  ;;  %v443_v57 = vld [vmem:[#allocation5 + $0x590] sm:$0xff]  ;;  %v293_v59 = vld [vmem:[#allocation5 + $0xe0] sm:$0xff] }
  0xae   :  { %v240_v62 = vadd.f32 %v239_v61, %v130_v58  ;;  %v437_v58 = vld [vmem:[#allocation5 + $0x560] sm:$0xff]  ;;  %v438_v61 = vld [vmem:[#allocation5 + $0x568] sm:$0xff] }
  0xaf   :  { %v180_v63 = vadd.f32 %v179_v54, %v160_v60  ;;  %v442_v54 = vld [vmem:[#allocation5 + $0x588] sm:$0xff] }
  0xb0   :  { %v259_v1 = vpop.f32.mrf.mxu3  ;;  %v358_v60 = vld [vmem:[#allocation5 + $0x2e8] sm:$0xff] }
  0xb1   :  { %v1209_v2 = vmax.f32 %v180_v63, 0.0  ;;  %v260_v3 = vadd.f32 %v259_v1, %v240_v62  ;;  %v432_v62 = vld [vmem:[#allocation5 + $0x538] sm:$0xff]  ;;  %v433_v1 = vld [vmem:[#allocation5 + $0x540] sm:$0xff] }
  0xb2   :  { %v288_v63 = vld [vmem:[#allocation5 + $0xb8] sm:$0xff] }
  0xb3   :  { %v199_v6 = vpop.f32.mrf.mxu2  ;;  %v1211_v7 = vmax.f32 %v260_v3, 0.0  ;;  %533 = vmatmul.f32.vlgmr.msrb.gmra.mxu3 %v1209_v2  ;;  %593 = vmatmul.f32.vlgmr.msrb.gmra.mxu1 %v1209_v2  ;;  %v427_v3 = vld [vmem:[#allocation5 + $0x510] sm:$0xff] }
  0xb4   :  { %v200_v8 = vadd.f32 %v199_v6, %v129_v0  ;;  %677 = vmatpush.msrb.mxu3 %v502_v4  ;;  %737 = vmatpush.msrb.mxu1 %v503_v5  ;;  %v353_v0 = vld [vmem:[#allocation5 + $0x2c0] sm:$0xff]  ;;  %v283_v4 = vld [vmem:[#allocation5 + $0x90] sm:$0xff]  ;;  %v348_v5 = vld [vmem:[#allocation5 + $0x298] sm:$0xff] }
  0xb5   :  { %573 = vmatmul.f32.vlgmr.msrb.gmra.mxu2 %v1211_v7  ;;  %v428_v6 = vld [vmem:[#allocation5 + $0x518] sm:$0xff] }
  0xb6   :  { %v220_v12 = vadd.f32 %v219_v56, %v200_v8  ;;  %717 = vmatpush.msrb.mxu2 %v423_v9  ;;  %678 = vmatpush.msrb.mxu3 %v497_v10  ;;  %v363_v56 = vld [vmem:[#allocation5 + $0x310] sm:$0xff]  ;;  %v344_v8 = vld [vmem:[#allocation5 + $0x278] sm:$0xff]  ;;  %v278_v10 = vld [vmem:[#allocation5 + $0x68] sm:$0xff] }
  0xb7   :  { %738 = vmatpush.msrb.mxu1 %v498_v11  ;;  %v504_v9 = vld [vmem:[#allocation5 + $0x778] sm:$0xff]  ;;  %v339_v11 = vld [vmem:[#allocation5 + $0x250] sm:$0xff] }
  0xb8   :  { %v1216_v16 = vmax.f32 %v220_v12, 0.0  ;;  %718 = vmatpush.msrb.mxu2 %v418_v13  ;;  %679 = vmatpush.msrb.mxu3 %v492_v14  ;;  %v499_v12 = vld [vmem:[#allocation5 + $0x750] sm:$0xff]  ;;  %v273_v13 = vld [vmem:[#allocation5 + $0x40] sm:$0xff]  ;;  %v334_v14 = vld [vmem:[#allocation5 + $0x228] sm:$0xff] }
  0xb9   :  { %739 = vmatpush.msrb.mxu1 %v493_v15  ;;  %v494_v15 = vld [vmem:[#allocation5 + $0x728] sm:$0xff] }
  0xba   :  { %553 = vmatmul.f32.vlgmr.msrb.gmra.mxu0 %v1216_v16  ;;  %719 = vmatpush.msrb.mxu2 %v413_v17  ;;  %v268_v17 = vld [vmem:[#allocation5 + $0x18] sm:$0xff] }
  0xbb   :  { %680 = vmatpush.msrb.mxu3 %v487_v18  ;;  %697 = vmatpush.msrb.mxu0 %v343_v19  ;;  %v329_v18 = vld [vmem:[#allocation5 + $0x200] sm:$0xff]  ;;  %v424_v19 = vld [vmem:[#allocation5 + $0x4f8] sm:$0xff] }
  0xbc   :  { %740 = vmatpush.msrb.mxu1 %v488_v20  ;;  %720 = vmatpush.msrb.mxu2 %v408_v21  ;;  %v489_v20 = vld [vmem:[#allocation5 + $0x700] sm:$0xff]  ;;  %v324_v21 = vld [vmem:[#allocation5 + $0x1d8] sm:$0xff] }
  0xbd   :  { %613 = vmatmul.f32.vlgmr.msra.gmra.mxu3 %v1216_v16  ;;  %653 = vmatmul.f32.vlgmr.msra.gmra.mxu2 %v1209_v2 }
  0xbe   :  { %673 = vmatmul.f32.vlgmr.msra.gmra.mxu1 %v1216_v16  ;;  %681 = vmatpush.msrb.mxu3 %v482_v22  ;;  %v419_v22 = vld [vmem:[#allocation5 + $0x4d0] sm:$0xff] }
  0xbf   :  { %698 = vmatpush.msrb.mxu0 %v338_v23  ;;  %721 = vmatpush.msrb.mxu2 %v403_v24  ;;  %v484_v23 = vld [vmem:[#allocation5 + $0x6d8] sm:$0xff] }
  0xc0   :  { %741 = vmatpush.msrb.mxu1 %v483_v25  ;;  %682 = vmatpush.msrb.mxu3 %v477_v26  ;;  %v837_v24 = vld [vmem:[#allocation7 + $0x78] sm:$0xff]  ;;  %v319_v25 = vld [vmem:[#allocation5 + $0x1b0] sm:$0xff] }
  0xc1   :  { %699 = vmatpush.msrb.mxu0 %v333_v27  ;;  %722 = vmatpush.msrb.mxu2 %v398_v28  ;;  %v836_v26 = vld [vmem:[#allocation7 + $0x70] sm:$0xff]  ;;  %v414_v27 = vld [vmem:[#allocation5 + $0x4a8] sm:$0xff] }
  0xc2   :  { %742 = vmatpush.msrb.mxu1 %v478_v29  ;;  %683 = vmatpush.msrb.mxu3 %v472_v30  ;;  %v479_v28 = vld [vmem:[#allocation5 + $0x6b0] sm:$0xff]  ;;  %v314_v29 = vld [vmem:[#allocation5 + $0x188] sm:$0xff] }
  0xc3   :  { %700 = vmatpush.msrb.mxu0 %v328_v31  ;;  %723 = vmatpush.msrb.mxu2 %v393_v32  ;;  %v835_v30 = vld [vmem:[#allocation7 + $0x68] sm:$0xff]  ;;  %v409_v31 = vld [vmem:[#allocation5 + $0x480] sm:$0xff] }
  0xc4   :  { %743 = vmatpush.msrb.mxu1 %v473_v33  ;;  %633 = vmatmul.f32.vlgmr.msra.gmra.mxu0 %v1211_v7  ;;  %v474_v32 = vld [vmem:[#allocation5 + $0x688] sm:$0xff]  ;;  %v309_v33 = vld [vmem:[#allocation5 + $0x160] sm:$0xff] }
  0xc5   :  { %684 = vmatpush.msrb.mxu3 %v467_v34  ;;  %701 = vmatpush.msrb.mxu0 %v323_v35  ;;  %v834_v34 = vld [vmem:[#allocation7 + $0x60] sm:$0xff]  ;;  %v404_v35 = vld [vmem:[#allocation5 + $0x458] sm:$0xff] }
  0xc6   :  { %724 = vmatpush.msrb.mxu2 %v388_v36  ;;  %744 = vmatpush.msrb.mxu1 %v468_v37  ;;  %v469_v36 = vld [vmem:[#allocation5 + $0x660] sm:$0xff]  ;;  %v304_v37 = vld [vmem:[#allocation5 + $0x138] sm:$0xff] }
  0xc7   :  { %685 = vmatpush.msrb.mxu3 %v462_v38  ;;  %702 = vmatpush.msrb.mxu0 %v318_v39  ;;  %v833_v38 = vld [vmem:[#allocation7 + $0x58] sm:$0xff]  ;;  %v399_v39 = vld [vmem:[#allocation5 + $0x430] sm:$0xff] }
  0xc8   :  { %725 = vmatpush.msrb.mxu2 %v383_v40  ;;  %745 = vmatpush.msrb.mxu1 %v463_v41  ;;  %v464_v40 = vld [vmem:[#allocation5 + $0x638] sm:$0xff]  ;;  %v299_v41 = vld [vmem:[#allocation5 + $0x110] sm:$0xff] }
  0xc9   :  { %686 = vmatpush.msrb.mxu3 %v457_v42  ;;  %703 = vmatpush.msrb.mxu0 %v313_v43  ;;  %v832_v42 = vld [vmem:[#allocation7 + $0x50] sm:$0xff]  ;;  %v394_v43 = vld [vmem:[#allocation5 + $0x408] sm:$0xff] }
  0xca   :  { %726 = vmatpush.msrb.mxu2 %v378_v44  ;;  %746 = vmatpush.msrb.mxu1 %v458_v45  ;;  %v459_v44 = vld [vmem:[#allocation5 + $0x610] sm:$0xff]  ;;  %v294_v45 = vld [vmem:[#allocation5 + $0xe8] sm:$0xff] }
  0xcb   :  { %687 = vmatpush.msrb.mxu3 %v452_v46  ;;  %704 = vmatpush.msrb.mxu0 %v308_v47  ;;  %v831_v46 = vld [vmem:[#allocation7 + $0x48] sm:$0xff]  ;;  %v389_v47 = vld [vmem:[#allocation5 + $0x3e0] sm:$0xff] }
  0xcc   :  { %727 = vmatpush.msrb.mxu2 %v373_v48  ;;  %747 = vmatpush.msrb.mxu1 %v453_v49  ;;  %v454_v48 = vld [vmem:[#allocation5 + $0x5e8] sm:$0xff]  ;;  %v289_v49 = vld [vmem:[#allocation5 + $0xc0] sm:$0xff] }
  0xcd   :  { %688 = vmatpush.msrb.mxu3 %v447_v50  ;;  %705 = vmatpush.msrb.mxu0 %v303_v51  ;;  %v830_v50 = vld [vmem:[#allocation7 + $0x40] sm:$0xff]  ;;  %v384_v51 = vld [vmem:[#allocation5 + $0x3b8] sm:$0xff] }
  0xce   :  { %728 = vmatpush.msrb.mxu2 %v368_v52  ;;  %748 = vmatpush.msrb.mxu1 %v448_v53  ;;  %v449_v52 = vld [vmem:[#allocation5 + $0x5c0] sm:$0xff]  ;;  %v284_v53 = vld [vmem:[#allocation5 + $0x98] sm:$0xff] }
  0xcf   :  { %689 = vmatpush.msrb.mxu3 %v442_v54  ;;  %706 = vmatpush.msrb.mxu0 %v298_v55  ;;  %v379_v54 = vld [vmem:[#allocation5 + $0x390] sm:$0xff]  ;;  %v444_v55 = vld [vmem:[#allocation5 + $0x598] sm:$0xff] }
  0xd0   :  { %729 = vmatpush.msrb.mxu2 %v363_v56  ;;  %749 = vmatpush.msrb.mxu1 %v443_v57  ;;  %v279_v56 = vld [vmem:[#allocation5 + $0x70] sm:$0xff]  ;;  %v374_v57 = vld [vmem:[#allocation5 + $0x368] sm:$0xff] }
  0xd1   :  { %690 = vmatpush.msrb.mxu3 %v437_v58  ;;  %707 = vmatpush.msrb.mxu0 %v293_v59  ;;  %v439_v58 = vld [vmem:[#allocation5 + $0x570] sm:$0xff]  ;;  %v274_v59 = vld [vmem:[#allocation5 + $0x48] sm:$0xff] }
  0xd2   :  { %730 = vmatpush.msrb.mxu2 %v358_v60  ;;  %750 = vmatpush.msrb.mxu1 %v438_v61  ;;  %v369_v60 = vld [vmem:[#allocation5 + $0x340] sm:$0xff]  ;;  %v434_v61 = vld [vmem:[#allocation5 + $0x548] sm:$0xff] }
  0xd3   :  { %691 = vmatpush.msrb.mxu3 %v432_v62  ;;  %708 = vmatpush.msrb.mxu0 %v288_v63  ;;  %v269_v62 = vld [vmem:[#allocation5 + $0x20] sm:$0xff]  ;;  %v364_v63 = vld [vmem:[#allocation5 + $0x318] sm:$0xff] }
  0xd4   :  { %731 = vmatpush.msrb.mxu2 %v353_v0  ;;  %751 = vmatpush.msrb.mxu1 %v433_v1  ;;  %v429_v0 = vld [vmem:[#allocation5 + $0x520] sm:$0xff]  ;;  %v359_v1 = vld [vmem:[#allocation5 + $0x2f0] sm:$0xff] }
  0xd5   :  { %692 = vmatpush.msrb.mxu3 %v427_v3  ;;  %709 = vmatpush.msrb.mxu0 %v283_v4  ;;  %v853_v3 = vld [vmem:[#allocation7 + $0xf8] sm:$0xff]  ;;  %v354_v4 = vld [vmem:[#allocation5 + $0x2c8] sm:$0xff] }
  0xd6   :  { %732 = vmatpush.msrb.mxu2 %v348_v5  ;;  %752 = vmatpush.msrb.mxu1 %v428_v6  ;;  %v852_v5 = vld [vmem:[#allocation7 + $0xf0] sm:$0xff]  ;;  %v349_v6 = vld [vmem:[#allocation5 + $0x2a0] sm:$0xff] }
  0xd7   :  { %693 = vmatmul.f32.vlgmr.msrb.gmra.mxu3 %v1211_v7  ;;  %733 = vmatmul.f32.vlgmr.msrb.gmra.mxu2 %v1216_v16 }
  0xd8   :  { %753 = vmatmul.f32.vlgmr.msrb.gmra.mxu1 %v1211_v7  ;;  %757 = vmatpush.msra.mxu3 %v344_v8  ;;  %v851_v8 = vld [vmem:[#allocation7 + $0xe8] sm:$0xff] }
  0xd9   :  { %797 = vmatpush.msra.mxu2 %v504_v9  ;;  %710 = vmatpush.msrb.mxu0 %v278_v10  ;;  %v850_v9 = vld [vmem:[#allocation7 + $0xe0] sm:$0xff]  ;;  %v849_v10 = vld [vmem:[#allocation7 + $0xd8] sm:$0xff] }
  0xda   :  { %758 = vmatpush.msra.mxu3 %v339_v11  ;;  %906 = vmatpush.msra.mxu1 %v837_v24  ;;  %v829_v11 = vld [vmem:[#allocation7 + $0x38] sm:$0xff]  ;;  %v842_v24 = vld [vmem:[#allocation7 + $0xa0] sm:$0xff] }
  0xdb   :  { %798 = vmatpush.msra.mxu2 %v499_v12  ;;  %711 = vmatpush.msrb.mxu0 %v273_v13  ;;  %v828_v12 = vld [vmem:[#allocation7 + $0x30] sm:$0xff]  ;;  %v827_v13 = vld [vmem:[#allocation7 + $0x28] sm:$0xff] }
  0xdc   :  { %759 = vmatpush.msra.mxu3 %v334_v14  ;;  %907 = vmatpush.msra.mxu1 %v836_v26  ;;  %v846_v14 = vld [vmem:[#allocation7 + $0xc0] sm:$0xff]  ;;  %v841_v26 = vld [vmem:[#allocation7 + $0x98] sm:$0xff] }
  0xdd   :  { %799 = vmatpush.msra.mxu2 %v494_v15  ;;  %712 = vmatpush.msrb.mxu0 %v268_v17  ;;  %v826_v15 = vld [vmem:[#allocation7 + $0x20] sm:$0xff]  ;;  %v845_v17 = vld [vmem:[#allocation7 + $0xb8] sm:$0xff] }
  0xde   :  { %713 = vmatmul.f32.vlgmr.msrb.gmra.mxu0 %v1209_v2  ;;  %760 = vmatpush.msra.mxu3 %v329_v18  ;;  %v844_v18 = vld [vmem:[#allocation7 + $0xb0] sm:$0xff] }
  0xdf   :  { %777 = vmatpush.msra.mxu0 %v424_v19  ;;  %800 = vmatpush.msra.mxu2 %v489_v20  ;;  %v824_v19 = vld [vmem:[#allocation7 + $0x10] sm:$0xff]  ;;  %v843_v20 = vld [vmem:[#allocation7 + $0xa8] sm:$0xff] }
  0xe0   :  { %761 = vmatpush.msra.mxu3 %v324_v21  ;;  %908 = vmatpush.msra.mxu1 %v835_v30  ;;  %v869_v21 = vld [vmem:[#allocation7 + $0x178] sm:$0xff]  ;;  %v866_v30 = vld [vmem:[#allocation7 + $0x160] sm:$0xff] }
  0xe1   :  { %778 = vmatpush.msra.mxu0 %v419_v22  ;;  %801 = vmatpush.msra.mxu2 %v484_v23  ;;  %v868_v22 = vld [vmem:[#allocation7 + $0x170] sm:$0xff]  ;;  %v823_v23 = vld [vmem:[#allocation7 + $0x8] sm:$0xff] }
  0xe2   :  { %762 = vmatpush.msra.mxu3 %v319_v25  ;;  %909 = vmatpush.msra.mxu1 %v834_v34  ;;  %v822_v25 = vld [vmem:[#allocation7] sm:$0xff]  ;;  %v883_v34 = vld [vmem:[#allocation7 + $0x1e8] sm:$0xff] }
  0xe3   :  { %779 = vmatpush.msra.mxu0 %v414_v27  ;;  %802 = vmatpush.msra.mxu2 %v479_v28  ;;  %v867_v27 = vld [vmem:[#allocation7 + $0x168] sm:$0xff]  ;;  %v885_v28 = vld [vmem:[#allocation7 + $0x1f8] sm:$0xff] }
  0xe4   :  { %763 = vmatpush.msra.mxu3 %v314_v29  ;;  %910 = vmatpush.msra.mxu1 %v833_v38  ;;  %v840_v29 = vld [vmem:[#allocation7 + $0x90] sm:$0xff]  ;;  %v863_v38 = vld [vmem:[#allocation7 + $0x148] sm:$0xff] }
  0xe5   :  { %780 = vmatpush.msra.mxu0 %v409_v31  ;;  %803 = vmatpush.msra.mxu2 %v474_v32  ;;  %v884_v31 = vld [vmem:[#allocation7 + $0x1f0] sm:$0xff]  ;;  %v839_v32 = vld [vmem:[#allocation7 + $0x88] sm:$0xff] }
  0xe6   :  { %764 = vmatpush.msra.mxu3 %v309_v33  ;;  %911 = vmatpush.msra.mxu1 %v832_v42  ;;  %v865_v33 = vld [vmem:[#allocation7 + $0x158] sm:$0xff] }
  0xe7   :  { %781 = vmatpush.msra.mxu0 %v404_v35  ;;  %804 = vmatpush.msra.mxu2 %v469_v36  ;;  %v838_v35 = vld [vmem:[#allocation7 + $0x80] sm:$0xff]  ;;  %v864_v36 = vld [vmem:[#allocation7 + $0x150] sm:$0xff]  ;;  %v861_v42 = vld [vmem:[#allocation7 + $0x138] sm:$0xff] }
  0xe8   :  { %765 = vmatpush.msra.mxu3 %v304_v37  ;;  %912 = vmatpush.msra.mxu1 %v831_v46  ;;  %v882_v37 = vld [vmem:[#allocation7 + $0x1e0] sm:$0xff] }
  0xe9   :  { %782 = vmatpush.msra.mxu0 %v399_v39  ;;  %805 = vmatpush.msra.mxu2 %v464_v40  ;;  %v881_v39 = vld [vmem:[#allocation7 + $0x1d8] sm:$0xff]  ;;  %v862_v40 = vld [vmem:[#allocation7 + $0x140] sm:$0xff] }
  0xea   :  { %766 = vmatpush.msra.mxu3 %v299_v41  ;;  %913 = vmatpush.msra.mxu1 %v830_v50  ;;  %v880_v41 = vld [vmem:[#allocation7 + $0x1d0] sm:$0xff]  ;;  %v1233_v46 = vld [vmem:[%s1250_s4] sm:$0x1f] }
  0xeb   :  { %783 = vmatpush.msra.mxu0 %v394_v43  ;;  %806 = vmatpush.msra.mxu2 %v459_v44  ;;  %v879_v43 = vld [vmem:[#allocation7 + $0x1c8] sm:$0xff]  ;;  %v860_v44 = vld [vmem:[#allocation7 + $0x130] sm:$0xff]  ;;  %v858_v50 = vld [vmem:[#allocation7 + $0x120] sm:$0xff] }
  0xec   :  { %767 = vmatpush.msra.mxu3 %v294_v45  ;;  %914 = vmatpush.msra.mxu1 %v829_v11  ;;  %v878_v45 = vld [vmem:[#allocation7 + $0x1c0] sm:$0xff]  ;;  %v871_v11 = vld [vmem:[#allocation7 + $0x188] sm:$0xff] }
  0xed   :  { %784 = vmatpush.msra.mxu0 %v389_v47  ;;  %807 = vmatpush.msra.mxu2 %v454_v48  ;;  %v507_v47 = vperm.slane %v1233_v46, 0  ;;  %v859_v48 = vld [vmem:[#allocation7 + $0x128] sm:$0xff] }
  0xee   :  { %768 = vmatpush.msra.mxu3 %v289_v49  ;;  %915 = vmatpush.msra.mxu1 %v828_v12  ;;  %v877_v49 = vld [vmem:[#allocation7 + $0x1b8] sm:$0xff]  ;;  %v870_v12 = vld [vmem:[#allocation7 + $0x180] sm:$0xff] }
  0xef   :  { %785 = vmatpush.msra.mxu0 %v384_v51  ;;  %808 = vmatpush.msra.mxu2 %v449_v52  ;;  %v876_v51 = vld [vmem:[#allocation7 + $0x1b0] sm:$0xff] }
  0xf0   :  { %769 = vmatpush.msra.mxu3 %v284_v53  ;;  %916 = vmatpush.msra.mxu1 %v827_v13  ;;  %v901_v13 = vld [vmem:[#allocation7 + $0x278] sm:$0xff] }
  0xf1   :  { %786 = vmatpush.msra.mxu0 %v379_v54  ;;  %809 = vmatpush.msra.mxu2 %v444_v55  ;;  %v857_v55 = vld [vmem:[#allocation7 + $0x118] sm:$0xff] }
  0xf2   :  { %770 = vmatpush.msra.mxu3 %v279_v56  ;;  %917 = vmatpush.msra.mxu1 %v826_v15  ;;  %v875_v56 = vld [vmem:[#allocation7 + $0x1a8] sm:$0xff] }
  0xf3   :  { %787 = vmatpush.msra.mxu0 %v374_v57  ;;  %810 = vmatpush.msra.mxu2 %v439_v58  ;;  %v508_v58 = vperm.slane %v1233_v46, 1  ;;  %v899_v15 = vld [vmem:[#allocation7 + $0x268] sm:$0xff] }
  0xf4   :  { %771 = vmatpush.msra.mxu3 %v274_v59 }
  0xf5   :  { %788 = vmatpush.msra.mxu0 %v369_v60  ;;  %811 = vmatpush.msra.mxu2 %v434_v61 }
  0xf6   :  { %772 = vmatpush.msra.mxu3 %v269_v62  ;;  %v856_v62 = vld [vmem:[#allocation7 + $0x110] sm:$0xff] }
  0xf7   :  { %789 = vmatpush.msra.mxu0 %v364_v63  ;;  %812 = vmatpush.msra.mxu2 %v429_v0  ;;  %v874_v63 = vld [vmem:[#allocation7 + $0x1a0] sm:$0xff] }
  0xf8   :  { %773 = vmatmul.f32.vlgmr.msra.gmra.mxu3 %v1209_v2  ;;  %813 = vmatmul.f32.vlgmr.msra.gmra.mxu2 %v1211_v7  ;;  %v848_v2 = vld [vmem:[#allocation7 + $0xd0] sm:$0xff]  ;;  %v847_v7 = vld [vmem:[#allocation7 + $0xc8] sm:$0xff] }
  0xf9   :  { %790 = vmatpush.msra.mxu0 %v359_v1  ;;  %926 = vmatpush.msrb.mxu3 %v853_v3  ;;  %v855_v1 = vld [vmem:[#allocation7 + $0x108] sm:$0xff]  ;;  %v873_v3 = vld [vmem:[#allocation7 + $0x198] sm:$0xff] }
  0xfa   :  { %966 = vmatpush.msrb.mxu2 %v885_v28 }
  0xfb   :  { %791 = vmatpush.msra.mxu0 %v354_v4  ;;  %927 = vmatpush.msrb.mxu3 %v852_v5 }
  0xfc   :  { %967 = vmatpush.msrb.mxu2 %v884_v31 }
  0xfd   :  { %792 = vmatpush.msra.mxu0 %v349_v6  ;;  %928 = vmatpush.msrb.mxu3 %v851_v8  ;;  %v854_v6 = vld [vmem:[#allocation7 + $0x100] sm:$0xff]  ;;  %v872_v8 = vld [vmem:[#allocation7 + $0x190] sm:$0xff] }
  0xfe   :  { %793 = vmatmul.f32.vlgmr.msra.gmra.mxu0 %v1216_v16  ;;  %v825_v16 = vld [vmem:[#allocation7 + $0x18] sm:$0xff]  ;;  %968 = vmatpush.msrb.mxu2 %v883_v34 }
  0xff   :  { %929 = vmatpush.msrb.mxu3 %v850_v9  ;;  %918 = vmatpush.msra.mxu1 %v825_v16  ;;  %v897_v16 = vld [vmem:[#allocation7 + $0x258] sm:$0xff] }
 0x100   :  { %946 = vmatpush.msrb.mxu0 %v869_v21  ;;  %969 = vmatpush.msrb.mxu2 %v882_v37  ;;  %v894_v21 = vld [vmem:[#allocation7 + $0x240] sm:$0xff]  ;;  %v889_v37 = vld [vmem:[#allocation7 + $0x218] sm:$0xff] }
 0x101   :  { %930 = vmatpush.msrb.mxu3 %v849_v10  ;;  %919 = vmatpush.msra.mxu1 %v824_v19  ;;  %v895_v19 = vld [vmem:[#allocation7 + $0x248] sm:$0xff] }
 0x102   :  { %947 = vmatpush.msrb.mxu0 %v868_v22  ;;  %970 = vmatpush.msrb.mxu2 %v881_v39 }
 0x103   :  { %931 = vmatpush.msrb.mxu3 %v848_v2  ;;  %920 = vmatpush.msra.mxu1 %v823_v23  ;;  %v893_v23 = vld [vmem:[#allocation7 + $0x238] sm:$0xff] }
 0x104   :  { %948 = vmatpush.msrb.mxu0 %v867_v27  ;;  %971 = vmatpush.msrb.mxu2 %v880_v41 }
 0x105   :  { %932 = vmatpush.msrb.mxu3 %v847_v7  ;;  %921 = vmatpush.msra.mxu1 %v822_v25  ;;  %v892_v25 = vld [vmem:[#allocation7 + $0x230] sm:$0xff] }
 0x106   :  { %949 = vmatpush.msrb.mxu0 %v866_v30  ;;  %972 = vmatpush.msrb.mxu2 %v879_v43 }
 0x107   :  { %933 = vmatpush.msrb.mxu3 %v846_v14  ;;  %v900_v14 = vld [vmem:[#allocation7 + $0x270] sm:$0xff]  ;;  %986 = vmatpush.msrb.mxu1 %v901_v13 }
 0x108   :  { %950 = vmatpush.msrb.mxu0 %v865_v33  ;;  %973 = vmatpush.msrb.mxu2 %v878_v45  ;;  %v890_v33 = vld [vmem:[#allocation7 + $0x220] sm:$0xff]  ;;  %v511_v45 = vperm.slane %v1233_v46, 4 }
 0x109   :  { %934 = vmatpush.msrb.mxu3 %v845_v17  ;;  %987 = vmatpush.msrb.mxu1 %v900_v14  ;;  %v898_v17 = vld [vmem:[#allocation7 + $0x260] sm:$0xff] }
 0x10a   :  { %951 = vmatpush.msrb.mxu0 %v864_v36  ;;  %974 = vmatpush.msrb.mxu2 %v877_v49 }
 0x10b   :  { %935 = vmatpush.msrb.mxu3 %v844_v18  ;;  %988 = vmatpush.msrb.mxu1 %v899_v15  ;;  %v896_v18 = vld [vmem:[#allocation7 + $0x250] sm:$0xff] }
 0x10c   :  { %952 = vmatpush.msrb.mxu0 %v863_v38  ;;  %975 = vmatpush.msrb.mxu2 %v876_v51 }
 0x10d   :  { %936 = vmatpush.msrb.mxu3 %v843_v20  ;;  %989 = vmatpush.msrb.mxu1 %v898_v17  ;;  %v509_v20 = vperm.slane %v1233_v46, 2 }
 0x10e   :  { %953 = vmatpush.msrb.mxu0 %v862_v40  ;;  %976 = vmatpush.msrb.mxu2 %v875_v56  ;;  %v888_v40 = vld [vmem:[#allocation7 + $0x210] sm:$0xff] }
 0x10f   :  { %937 = vmatpush.msrb.mxu3 %v842_v24  ;;  %990 = vmatpush.msrb.mxu1 %v897_v16 }
 0x110   :  { %954 = vmatpush.msrb.mxu0 %v861_v42  ;;  %977 = vmatpush.msrb.mxu2 %v874_v63  ;;  %v887_v42 = vld [vmem:[#allocation7 + $0x208] sm:$0xff] }
 0x111   :  { %938 = vmatpush.msrb.mxu3 %v841_v26  ;;  %991 = vmatpush.msrb.mxu1 %v896_v18  ;;  %v891_v26 = vld [vmem:[#allocation7 + $0x228] sm:$0xff] }
 0x112   :  { %955 = vmatpush.msrb.mxu0 %v860_v44  ;;  %978 = vmatpush.msrb.mxu2 %v873_v3  ;;  %v886_v44 = vld [vmem:[#allocation7 + $0x200] sm:$0xff] }
 0x113   :  { %939 = vmatpush.msrb.mxu3 %v840_v29  ;;  %992 = vmatpush.msrb.mxu1 %v895_v19  ;;  %v510_v29 = vperm.slane %v1233_v46, 3 }
 0x114   :  { %956 = vmatpush.msrb.mxu0 %v859_v48  ;;  %979 = vmatpush.msrb.mxu2 %v872_v8 }
 0x115   :  { %940 = vmatpush.msrb.mxu3 %v839_v32  ;;  %993 = vmatpush.msrb.mxu1 %v894_v21 }
 0x116   :  { %957 = vmatpush.msrb.mxu0 %v858_v50  ;;  %980 = vmatpush.msrb.mxu2 %v871_v11 }
 0x117   :  { %941 = vmatpush.msrb.mxu3 %v838_v35  ;;  %994 = vmatpush.msrb.mxu1 %v893_v23 }
 0x118   :  { %958 = vmatpush.msrb.mxu0 %v857_v55  ;;  %981 = vmatpush.msrb.mxu2 %v870_v12 }
 0x119   :  { %995 = vmatpush.msrb.mxu1 %v892_v25 }
 0x11a   :  { %959 = vmatpush.msrb.mxu0 %v856_v62 }
 0x11b   :  { %996 = vmatpush.msrb.mxu1 %v891_v26 }
 0x11c   :  { %960 = vmatpush.msrb.mxu0 %v855_v1 }
 0x11d   :  { %997 = vmatpush.msrb.mxu1 %v890_v33 }
 0x11e   :  { %961 = vmatpush.msrb.mxu0 %v854_v6 }
 0x11f   :  { %998 = vmatpush.msrb.mxu1 %v889_v37 }
 0x121   :  { %999 = vmatpush.msrb.mxu1 %v888_v40 }
 0x123   :  { %1000 = vmatpush.msrb.mxu1 %v887_v42 }
 0x125   :  { %1001 = vmatpush.msrb.mxu1 %v886_v44 }
 0x130   :  { %v594_v60 = vpop.f32.mrf.mxu1 }
 0x131   :  { %v595_v4 = vadd.f32 %v594_v60, %v508_v58 }
 0x136   :  { %v534_v52 = vpop.f32.mrf.mxu3 }
 0x137   :  { %v535_v53 = vadd.f32 %v534_v52, %v507_v47  ;;  %v554_v54 = vpop.f32.mrf.mxu0 }
 0x138   :  { %v574_v59 = vpop.f32.mrf.mxu2 }
 0x139   :  { %v555_v57 = vadd.f32 %v554_v54, %v535_v53  ;;  %v1038_v54 = vld [vmem:[%s1252_s6] ss:$0 sm:$0xff] }
 0x13b   :  { %v575_v61 = vadd.f32 %v574_v59, %v555_v57  ;;  %v674_v27 = vpop.f32.mrf.mxu1 }
 0x13d   :  { %v817_v0 = vmax.f32 %v575_v61, 0.0 }
 0x13f   :  { %922 = vmatmul.f32.vlgmr.msra.gmra.mxu1 %v817_v0 }
 0x140   :  { %v614_v5 = vpop.f32.mrf.mxu3  ;;  %v654_v22 = vpop.f32.mrf.mxu2 }
 0x141   :  { %v615_v9 = vadd.f32 %v614_v5, %v595_v4  ;;  %v634_v10 = vpop.f32.mrf.mxu0  ;;  %v655_v24 = vadd.f32 %v654_v22, %v509_v20 }
 0x143   :  { %v635_v2 = vadd.f32 %v634_v10, %v615_v9  ;;  %v675_v28 = vadd.f32 %v674_v27, %v655_v24 }
 0x145   :  { %v818_v7 = vmax.f32 %v635_v2, 0.0 }
 0x147   :  { %942 = vmatmul.f32.vlgmr.msrb.gmra.mxu3 %v818_v7 }
 0x155   :  { %v754_v39 = vpop.f32.mrf.mxu1 }
 0x15a   :  { %v694_v30 = vpop.f32.mrf.mxu3  ;;  %v734_v36 = vpop.f32.mrf.mxu2 }
 0x15b   :  { %v695_v31 = vadd.f32 %v694_v30, %v675_v28  ;;  %v714_v32 = vpop.f32.mrf.mxu0 }
 0x15c   :  { %v715_v35 = vadd.f32 %v714_v32, %v510_v29 }
 0x15d   :  { %v819_v34 = vmax.f32 %v695_v31, 0.0 }
 0x15e   :  { %v735_v38 = vadd.f32 %v734_v36, %v715_v35 }
 0x15f   :  { %962 = vmatmul.f32.vlgmr.msrb.gmra.mxu0 %v819_v34 }
 0x160   :  { %v755_v41 = vadd.f32 %v754_v39, %v735_v38 }
 0x162   :  { %v820_v43 = vmax.f32 %v755_v41, 0.0 }
 0x164   :  { %982 = vmatmul.f32.vlgmr.msrb.gmra.mxu2 %v820_v43 }
 0x17b   :  { %v774_v47 = vpop.f32.mrf.mxu3  ;;  %v794_v49 = vpop.f32.mrf.mxu0 }
 0x17c   :  { %v775_v48 = vadd.f32 %v774_v47, %v511_v45  ;;  %v814_v51 = vpop.f32.mrf.mxu2 }
 0x17e   :  { %v795_v50 = vadd.f32 %v794_v49, %v775_v48 }
 0x180   :  { %v815_v52 = vadd.f32 %v814_v51, %v795_v50 }
 0x182   :  { %v821_v53 = vmax.f32 %v815_v52, 0.0 }
 0x184   :  { %1002 = vmatmul.f32.vlgmr.msrb.gmra.mxu1 %v821_v53 }
 0x1bc   :  { %v923_v55 = vpop.f32.mrf.mxu1 }
 0x1bd   :  { %v924_v57 = vadd.f32 %v1038_v54, %v923_v55 }
 0x1ca   :  { %v943_v56 = vpop.f32.mrf.mxu3 }
 0x1cb   :  { %v944_v59 = vadd.f32 %v943_v56, %v924_v57 }
 0x1dc   :  { %v963_v58 = vpop.f32.mrf.mxu0 }
 0x1dd   :  { %v964_v61 = vadd.f32 %v963_v58, %v944_v59 }
 0x1e7   :  { %v983_v60 = vpop.f32.mrf.mxu2 }
 0x1e8   :  { %v984_v46 = vadd.f32 %v983_v60, %v964_v61 }
 0x201   :  { %v1003_v62 = vpop.f32.mrf.mxu1 }
 0x202   :  { %v1004_v63 = vadd.f32 %v1003_v62, %v984_v46 }
 0x204   :  { %1006 = vst [vmem:[#allocation8] sm:$0x3] %v1004_v63 }
 0x205   :  { %1017 = dma.vmem_to_hbm [thread:$0]  %s1013_s25, 32, %s1015_s28, [#allocation4]  }
 0x206   :  { %1139 = dma.done.wait [#allocation4], 32  }
 0x207   :  { %1140 = vsyncadd [#allocation4], 4294967264 }
 0x208   :  { %1022 = vsyncpa [#allocation3], 1 }
 0x209   :  { %1023 = vsyncpa [#allocation6], 1 }
 0x20a   :  { %1024 = vsyncpa [#allocation4], 1 }

</bundles_post_ra>
